<compile_context>
chip_gen: v7x
topology: tpu7x:2x2x1
jax: 0.10.0
libtpu: 0.0.40
codegen_flags: <defaults>
</compile_context>

<pallas_src>
import functools

import jax
import jax.numpy as jnp
from jax.experimental import pallas as pl
from jax.experimental.pallas import tpu as pltpu


# ----------------------------------------------------------------------------
# helpers
# ----------------------------------------------------------------------------
def _ceil_to(x, m):
    return (x + m - 1) // m * m


def _choose_tile(dim, pref, align):
    """Return (tile, padded_dim) with padded_dim % tile == 0, tile aligned."""
    if dim <= pref:
        p = _ceil_to(dim, align)
        return p, p
    p = _ceil_to(dim, pref)
    return pref, p


# ----------------------------------------------------------------------------
# Pallas kernels
# ----------------------------------------------------------------------------
def _matmul_bias_kernel(x_ref, w_ref, b_ref, o_ref, acc_ref):
    @pl.when(pl.program_id(2) == 0)
    def _init():
        acc_ref[...] = jnp.zeros_like(acc_ref)

    acc_ref[...] += jnp.dot(x_ref[...], w_ref[...],
                            preferred_element_type=jnp.float32)

    @pl.when(pl.program_id(2) == pl.num_programs(2) - 1)
    def _store():
        o_ref[...] = (acc_ref[...] + b_ref[...]).astype(o_ref.dtype)


def matmul_bias(x, w, b, *, tm_pref=512, tk_pref=512, tn_pref=512):
    """(M, K) @ (K, C) + b -> (M, C). bf16 MXU operands, f32 accumulation."""
    M, K = x.shape
    K2, C = w.shape
    assert K2 == K and b.shape == (C,)

    tm, Mp = _choose_tile(M, tm_pref, 8)
    tk, Kp = _choose_tile(K, tk_pref, 128)
    tn, Cp = _choose_tile(C, tn_pref, 128)

    xb = x if x.dtype == jnp.bfloat16 else x.astype(jnp.bfloat16)
    xb = jnp.pad(xb, ((0, Mp - M), (0, Kp - K)))
    wb = jnp.pad(w.astype(jnp.bfloat16), ((0, Kp - K), (0, Cp - C)))
    bp = jnp.pad(b.astype(jnp.float32), (0, Cp - C)).reshape(1, Cp)

    out = pl.pallas_call(
        _matmul_bias_kernel,
        out_shape=jax.ShapeDtypeStruct((Mp, Cp), jnp.float32),
        grid_spec=pltpu.PrefetchScalarGridSpec(
            num_scalar_prefetch=0,
            grid=(Mp // tm, Cp // tn, Kp // tk),
            in_specs=[
                pl.BlockSpec((tm, tk), lambda i, j, k: (i, k)),
                pl.BlockSpec((tk, tn), lambda i, j, k: (k, j)),
                pl.BlockSpec((1, tn), lambda i, j, k: (0, j)),
            ],
            out_specs=pl.BlockSpec((tm, tn), lambda i, j, k: (i, j)),
            scratch_shapes=[pltpu.VMEM((tm, tn), jnp.float32)],
        ),
        compiler_params=pltpu.CompilerParams(
            dimension_semantics=("parallel", "parallel", "arbitrary"),
            vmem_limit_bytes=32 * 1024 * 1024,
        ),
    )(xb, wb, bp)
    if (Mp, Cp) != (M, C):
        out = out[:M, :C]
    return out


def _in_stats_kernel(x_ref, g_ref, b_ref, scale_ref, shift_ref,
                     sum_ref, sq_ref, *, eps, inv_count):
    l = pl.program_id(1)

    @pl.when(l == 0)
    def _init():
        sum_ref[...] = jnp.zeros_like(sum_ref)
        sq_ref[...] = jnp.zeros_like(sq_ref)

    x = x_ref[...]                                      # (1, tl, C) f32
    sum_ref[...] += jnp.sum(x, axis=1, keepdims=True)
    sq_ref[...] += jnp.sum(x * x, axis=1, keepdims=True)

    @pl.when(l == pl.num_programs(1) - 1)
    def _finalize():
        mean = sum_ref[...] * inv_count
        var = sq_ref[...] * inv_count - mean * mean     # biased, like PyTorch IN
        rstd = jax.lax.rsqrt(var + eps)
        scale = g_ref[...] * rstd
        scale_ref[...] = scale
        shift_ref[...] = b_ref[...] - mean * scale


def _in_apply_kernel(x_ref, scale_ref, shift_ref, o_ref, *, neg_slope):
    y = x_ref[...] * scale_ref[...] + shift_ref[...]
    if neg_slope == 0.0:
        y = jnp.maximum(y, 0.0)                         # ReLU
    else:
        y = jnp.where(y >= 0.0, y, y * neg_slope)       # LeakyReLU(0.2)
    o_ref[...] = y.astype(o_ref.dtype)


def instance_norm_act(x_nlc, gamma, beta, *, eps=1e-5, neg_slope=0.0,
                      tl_pref=512):
    """Per-(n, c) normalization over the spatial axis L, affine + activation."""
    N, L, C = x_nlc.shape
    Cp = _ceil_to(C, 128)
    tl, Lp = _choose_tile(L, tl_pref, 8)

    xp = x_nlc
    if (Lp, Cp) != (L, C):
        xp = jnp.pad(x_nlc, ((0, 0), (0, Lp - L), (0, Cp - C)))
    g = jnp.pad(gamma.astype(jnp.float32), (0, Cp - C)).reshape(1, 1, Cp)
    bt = jnp.pad(beta.astype(jnp.float32), (0, Cp - C)).reshape(1, 1, Cp)
    n_l = Lp // tl

    stats_kern = functools.partial(_in_stats_kernel, eps=eps, inv_count=1.0 / L)
    scale, shift = pl.pallas_call(
        stats_kern,
        out_shape=(jax.ShapeDtypeStruct((N, 1, Cp), jnp.float32),
                   jax.ShapeDtypeStruct((N, 1, Cp), jnp.float32)),
        grid_spec=pltpu.PrefetchScalarGridSpec(
            num_scalar_prefetch=0,
            grid=(N, n_l),
            in_specs=[
                pl.BlockSpec((1, tl, Cp), lambda n, l: (n, l, 0)),
                pl.BlockSpec((1, 1, Cp), lambda n, l: (0, 0, 0)),
                pl.BlockSpec((1, 1, Cp), lambda n, l: (0, 0, 0)),
            ],
            out_specs=(pl.BlockSpec((1, 1, Cp), lambda n, l: (n, 0, 0)),
                       pl.BlockSpec((1, 1, Cp), lambda n, l: (n, 0, 0))),
            scratch_shapes=[pltpu.VMEM((1, 1, Cp), jnp.float32),
                            pltpu.VMEM((1, 1, Cp), jnp.float32)],
        ),
        compiler_params=pltpu.CompilerParams(
            dimension_semantics=("parallel", "arbitrary"),
            vmem_limit_bytes=32 * 1024 * 1024,
        ),
    )(xp, g, bt)

    apply_kern = functools.partial(_in_apply_kernel, neg_slope=neg_slope)
    y = pl.pallas_call(
        apply_kern,
        out_shape=jax.ShapeDtypeStruct((N, Lp, Cp), jnp.float32),
        grid_spec=pltpu.PrefetchScalarGridSpec(
            num_scalar_prefetch=0,
            grid=(N, n_l),
            in_specs=[
                pl.BlockSpec((1, tl, Cp), lambda n, l: (n, l, 0)),
                pl.BlockSpec((1, 1, Cp), lambda n, l: (n, 0, 0)),
                pl.BlockSpec((1, 1, Cp), lambda n, l: (n, 0, 0)),
            ],
            out_specs=pl.BlockSpec((1, tl, Cp), lambda n, l: (n, l, 0)),
        ),
        compiler_params=pltpu.CompilerParams(
            dimension_semantics=("parallel", "parallel"),
            vmem_limit_bytes=32 * 1024 * 1024,
        ),
    )(xp, scale, shift)
    if (Lp, Cp) != (L, C):
        y = y[:, :L, :C]
    return y


# ----------------------------------------------------------------------------
# im2col glue (plain JAX, channels-last)
# ----------------------------------------------------------------------------
def _im2col_nhwc(x, kernel, stride):
    N, H, W, C = x.shape
    Ho = (H - kernel) // stride + 1
    Wo = (W - kernel) // stride + 1
    cols = []
    for kh in range(kernel):
        for kw in range(kernel):
            cols.append(x[:, kh:kh + stride * Ho:stride,
                          kw:kw + stride * Wo:stride, :])
    p = jnp.stack(cols, axis=3)                    # (N, Ho, Wo, k*k, C)
    return p.reshape(N * Ho * Wo, kernel * kernel * C), Ho, Wo


def _deconv_weight_matrix(w_t, cg):
    """Subpixel sub-kernels of ConvTranspose2d weight (Cin, Cout, 4, 4).

    Column group pc = 2*ph + pw holds the 2x2 sub-kernel for output parity
    (ph, pw); rows are ordered (dh, dw, ci) to match _im2col_nhwc(kernel=2).
    """
    Cin, Cout = w_t.shape[0], w_t.shape[1]
    blocks = []
    for ph in range(2):
        for pw in range(2):
            sub = jnp.stack(
                [jnp.stack([w_t[:, :, 3 - ph - 2 * dh, 3 - pw - 2 * dw]
                            for dw in range(2)], axis=0)
                 for dh in range(2)], axis=0)      # (2, 2, Cin, Cout)
            sub = sub.reshape(4 * Cin, Cout)
            sub = jnp.pad(sub, ((0, 0), (0, cg - Cout)))
            blocks.append(sub)
    return jnp.concatenate(blocks, axis=1)         # (4*Cin, 4*cg)


# ----------------------------------------------------------------------------
# CNNBlock forward paths (channels-last internals)
# ----------------------------------------------------------------------------
def cnn_block_encoder_nhwc(x_nhwc, w, b):
    """Conv2d(Cin, Cout, k=4, s=2, p=1, padding_mode='reflect')."""
    N, H, W, Cin = x_nhwc.shape
    Cout = w.shape[0]
    xp = jnp.pad(x_nhwc, ((0, 0), (1, 1), (1, 1), (0, 0)), mode="reflect")
    xp = xp.astype(jnp.bfloat16)                   # bf16 before im2col: half the HBM traffic
    patches, Ho, Wo = _im2col_nhwc(xp, kernel=4, stride=2)
    wm = w.transpose(2, 3, 1, 0).reshape(16 * Cin, Cout)   # (kh, kw, ci) x co
    y = matmul_bias(patches, wm, b)                # (N*Ho*Wo, Cout)
    return y.reshape(N, Ho, Wo, Cout)


def cnn_block_decoder_nhwc(x_nhwc, w_t, b, gamma, beta, act="relu"):
    """ConvTranspose2d(k=4, s=2, p=1) -> InstanceNorm2d(affine) -> (Leaky)ReLU."""
    N, H, W, Cin = x_nhwc.shape
    Cout = w_t.shape[1]                            # PyTorch layout (Cin, Cout, 4, 4)
    Cg = _ceil_to(Cout, 128)                       # lane-dense per-parity group

    # Subpixel decomposition: pad by 1, 2x2 stride-1 windows; parity (ph, pw)
    # of the 2Hx2W output uses windows offset by (ph, pw) and a 2x2 sub-kernel.
    xp = jnp.pad(x_nhwc, ((0, 0), (1, 1), (1, 1), (0, 0))).astype(jnp.bfloat16)
    patches, Hw, Ww = _im2col_nhwc(xp, kernel=2, stride=1)   # Hw=H+1, Ww=W+1
    wm = _deconv_weight_matrix(w_t, Cg)                      # (4*Cin, 4*Cg)
    bm = jnp.tile(jnp.pad(b, (0, Cg - Cout)), 4)             # (4*Cg,)
    y = matmul_bias(patches, wm, bm)                         # (N*Hw*Ww, 4*Cg)
    y = y.reshape(N, Hw, Ww, 4, Cg)

    # Interleave the four parity outputs into the (2H, 2W) grid (pixel shuffle).
    rows = []
    for ph in range(2):
        cols = [y[:, ph:ph + H, pw:pw + W, 2 * ph + pw, :] for pw in range(2)]
        rows.append(jnp.stack(cols, axis=3))       # (N, H, W, 2, Cg)
    blk = jnp.stack(rows, axis=2)                  # (N, H, 2, W, 2, Cg)
    z = blk.reshape(N, 2 * H, 2 * W, Cg)

    neg = 0.0 if act == "relu" else 0.2
    g = jnp.pad(gamma, (0, Cg - Cout))             # padded channels -> scale/shift 0
    bb = jnp.pad(beta, (0, Cg - Cout))
    z = instance_norm_act(z.reshape(N, 4 * H * W, Cg), g, bb,
                          eps=1e-5, neg_slope=neg)
    return z.reshape(N, 2 * H, 2 * W, Cg)[:, :, :, :Cout]


class CNNBlock:
    """JAX/Pallas port of the PyTorch CNNBlock (inference semantics)."""

    def __init__(self, in_channels, out_channels, asencoder, use_dropout=False,
                 act="relu", dropout=0.4, key=None):
        if key is None:
            key = jax.random.PRNGKey(0)
        self.asencoder = asencoder
        self.use_dropout = use_dropout
        self.act = act
        ks = jax.random.split(key, 4)
        if asencoder:
            self.w = 0.1 * jax.random.normal(ks[0], (out_channels, in_channels, 4, 4), jnp.float32)
            self.b = 0.1 * jax.random.normal(ks[1], (out_channels,), jnp.float32)
        else:
            self.w = 0.1 * jax.random.normal(ks[0], (in_channels, out_channels, 4, 4), jnp.float32)
            self.b = 0.1 * jax.random.normal(ks[1], (out_channels,), jnp.float32)
            self.gamma = 1.0 + 0.1 * jax.random.normal(ks[2], (out_channels,), jnp.float32)
            self.beta = 0.1 * jax.random.normal(ks[3], (out_channels,), jnp.float32)

    def forward_nhwc(self, x_nhwc):
        if self.asencoder:
            return cnn_block_encoder_nhwc(x_nhwc, self.w, self.b)
        return cnn_block_decoder_nhwc(x_nhwc, self.w, self.b,
                                      self.gamma, self.beta, act=self.act)

    def __call__(self, x_nchw):
        # NCHW <-> NHWC only at the module boundary; stack blocks via forward_nhwc.
        y = self.forward_nhwc(jnp.transpose(x_nchw, (0, 2, 3, 1)))
        # TODO(synk): train-mode Dropout2d not implemented (inference identity).
        return jnp.transpose(y, (0, 3, 1, 2))


# ----------------------------------------------------------------------------
if __name__ == "__main__":
    key = jax.random.PRNGKey(0)
    kx, kenc, kdec = jax.random.split(key, 3)

    N, Cin, H, W = 2, 4, 16, 16
    x = jax.random.normal(kx, (N, Cin, H, W), jnp.float32)

    # Encoder block: Conv2d(4 -> 8, k=4, s=2, p=1, reflect)
    enc = CNNBlock(in_channels=4, out_channels=8, asencoder=True, key=kenc)
    # Decoder block: ConvTranspose2d(8 -> 4) -> InstanceNorm2d -> LeakyReLU(0.2)
    dec = CNNBlock(in_channels=8, out_channels=4, asencoder=False, act="leaky", key=kdec)

    enc_fn = jax.jit(lambda t: enc(t))
    dec_fn = jax.jit(lambda t: dec(t))

    y_enc = jax.block_until_ready(enc_fn(x))
    assert y_enc.shape == (N, 8, H // 2, W // 2)

    y_dec = jax.block_until_ready(dec_fn(y_enc))
    assert y_dec.shape == (N, 4, H, W)

    # References use bf16-rounded operands (matches the MXU operand precision).
    def r(a):
        return a.astype(jnp.bfloat16).astype(jnp.float32)

    xp = jnp.pad(x, ((0, 0), (0, 0), (1, 1), (1, 1)), mode="reflect")
    ref_enc = jax.lax.conv_general_dilated(
        r(xp), r(enc.w), window_strides=(2, 2), padding="VALID",
        dimension_numbers=("NCHW", "OIHW", "NCHW"),
        precision=jax.lax.Precision.HIGHEST) + enc.b.reshape(1, -1, 1, 1)
    assert jnp.allclose(y_enc, ref_enc, rtol=2e-3, atol=2e-3), "encoder mismatch"

    w_eq = jnp.flip(dec.w, axis=(2, 3)).transpose(1, 0, 2, 3)
    conv_t = jax.lax.conv_general_dilated(
        r(y_enc), r(w_eq), window_strides=(1, 1), padding=((2, 2), (2, 2)),
        lhs_dilation=(2, 2), dimension_numbers=("NCHW", "OIHW", "NCHW"),
        precision=jax.lax.Precision.HIGHEST) + dec.b.reshape(1, -1, 1, 1)
    mean = conv_t.mean(axis=(2, 3), keepdims=True)
    var = conv_t.var(axis=(2, 3), keepdims=True)
    ref_dec = (conv_t - mean) * jax.lax.rsqrt(var + 1e-5)
    ref_dec = ref_dec * dec.gamma.reshape(1, -1, 1, 1) + dec.beta.reshape(1, -1, 1, 1)
    ref_dec = jnp.where(ref_dec >= 0.0, ref_dec, 0.2 * ref_dec)
    assert jnp.allclose(y_dec, ref_dec, rtol=5e-3, atol=5e-3), "decoder mismatch"

    print("KERNEL_OK")
</pallas_src>

<mosaic_0001>
module attributes {stable_mosaic.version = 11 : i64} {
  func.func @_matmul_bias_kernel(%arg0: i32, %arg1: i32, %arg2: i32, %arg3: memref<128x128xbf16, #tpu.memory_space<vmem>>, %arg4: memref<128x128xbf16, #tpu.memory_space<vmem>>, %arg5: memref<1x128xf32, #tpu.memory_space<vmem>>, %arg6: memref<128x128xf32, #tpu.memory_space<vmem>>, %arg7: memref<128x128xf32, #tpu.memory_space<vmem>>) attributes {dimension_semantics = [#tpu.dimension_semantics<parallel>, #tpu.dimension_semantics<parallel>, #tpu.dimension_semantics<arbitrary>], iteration_bounds = array<i64: 1, 1, 1>, scalar_prefetch = 0 : i64, scratch_operands = 1 : i64, tpu.core_type = #tpu.core_type<tc>, window_params = [{transform_indices = @transform_0, window_bounds = array<i64: 128, 128>}, {transform_indices = @transform_1, window_bounds = array<i64: 128, 128>}, {transform_indices = @transform_2, window_bounds = array<i64: 1, 128>}, {transform_indices = @transform_3, window_bounds = array<i64: 128, 128>}]} {
    %c0_i32 = arith.constant 0 : i32
    %0 = arith.cmpi eq, %arg2, %c0_i32 : i32
    %1 = arith.extui %0 : i1 to i32
    %c0_i32_0 = arith.constant 0 : i32
    %2 = arith.cmpi ne, %1, %c0_i32_0 : i32
    scf.if %2 {
      %cst_10 = arith.constant 0.000000e+00 : f32
      %12 = vector.broadcast %cst_10 : f32 to vector<128x128xf32>
      %c0_11 = arith.constant 0 : index
      %c0_12 = arith.constant 0 : index
      %13 = vector.load %arg7[%c0_11, %c0_12] : memref<128x128xf32, #tpu.memory_space<vmem>>, vector<128x128xf32>
      tpu.vector_store %arg7[%c0_11, %c0_12], %12 {strides = array<i32>} : memref<128x128xf32, #tpu.memory_space<vmem>>, vector<128x128xf32>,
    } else {
    }
    %c0 = arith.constant 0 : index
    %c0_1 = arith.constant 0 : index
    %3 = vector.load %arg7[%c0, %c0_1] : memref<128x128xf32, #tpu.memory_space<vmem>>, vector<128x128xf32>
    %c0_2 = arith.constant 0 : index
    %c0_3 = arith.constant 0 : index
    %4 = vector.load %arg3[%c0_2, %c0_3] : memref<128x128xbf16, #tpu.memory_space<vmem>>, vector<128x128xbf16>
    %c0_4 = arith.constant 0 : index
    %c0_5 = arith.constant 0 : index
    %5 = vector.load %arg4[%c0_4, %c0_5] : memref<128x128xbf16, #tpu.memory_space<vmem>>, vector<128x128xbf16>
    %cst = arith.constant dense<0.000000e+00> : vector<128x128xf32>
    %6 = tpu.matmul %4, %5, %cst {dimension_numbers = #tpu.dot_dimension_numbers<[1], [0], [0], [1], [0, 0, 1, 1], [], []>} : vector<128x128xbf16>, vector<128x128xbf16>, vector<128x128xf32> -> vector<128x128xf32>
    %7 = arith.addf %3, %6 : vector<128x128xf32>
    %c0_6 = arith.constant 0 : index
    %c0_7 = arith.constant 0 : index
    %8 = vector.load %arg7[%c0_6, %c0_7] : memref<128x128xf32, #tpu.memory_space<vmem>>, vector<128x128xf32>
    tpu.vector_store %arg7[%c0_6, %c0_7], %7 {strides = array<i32>} : memref<128x128xf32, #tpu.memory_space<vmem>>, vector<128x128xf32>,
    %c0_i32_8 = arith.constant 0 : i32
    %9 = arith.cmpi eq, %arg2, %c0_i32_8 : i32
    %10 = arith.extui %9 : i1 to i32
    %c0_i32_9 = arith.constant 0 : i32
    %11 = arith.cmpi ne, %10, %c0_i32_9 : i32
    scf.if %11 {
      %c0_10 = arith.constant 0 : index
      %c0_11 = arith.constant 0 : index
      %12 = vector.load %arg7[%c0_10, %c0_11] : memref<128x128xf32, #tpu.memory_space<vmem>>, vector<128x128xf32>
      %c0_12 = arith.constant 0 : index
      %c0_13 = arith.constant 0 : index
      %13 = vector.load %arg5[%c0_12, %c0_13] : memref<1x128xf32, #tpu.memory_space<vmem>>, vector<1x128xf32>
      %14 = vector.broadcast %13 : vector<1x128xf32> to vector<128x128xf32>
      %15 = arith.addf %12, %14 : vector<128x128xf32>
      %c0_14 = arith.constant 0 : index
      %c0_15 = arith.constant 0 : index
      %16 = vector.load %arg6[%c0_14, %c0_15] : memref<128x128xf32, #tpu.memory_space<vmem>>, vector<128x128xf32>
      tpu.vector_store %arg6[%c0_14, %c0_15], %15 {strides = array<i32>} : memref<128x128xf32, #tpu.memory_space<vmem>>, vector<128x128xf32>,
    } else {
    }
    return
  }
  func.func @transform_0(%arg0: i32, %arg1: i32, %arg2: i32) -> (i32, i32) {
    %c0_i32 = arith.constant 0 : i32
    return %arg0, %arg2 : i32, i32
  }
  func.func @transform_1(%arg0: i32, %arg1: i32, %arg2: i32) -> (i32, i32) {
    %c0_i32 = arith.constant 0 : i32
    return %arg2, %arg1 : i32, i32
  }
  func.func @transform_2(%arg0: i32, %arg1: i32, %arg2: i32) -> (i32, i32) {
    %c0_i32 = arith.constant 0 : i32
    %c0_i32_0 = arith.constant 0 : i32
    return %c0_i32, %arg1 : i32, i32
  }
  func.func @transform_3(%arg0: i32, %arg1: i32, %arg2: i32) -> (i32, i32) {
    %c0_i32 = arith.constant 0 : i32
    return %arg0, %arg1 : i32, i32
  }
}

</mosaic_0001>

<bundles_post_ra>
// kernel: _lambda_.1
= control target key start
LH: loop header
LB: loop body
LE: loop exit
PB: predicated region body
PF: predicated region fallthrough
CT: control target
= control target key end

     0   :  { %s586_s1 = inlined_call_operand.vmem [shape: bf16[128,128], index: 1, kind: input, shape index: {}]   ;;  %s587_s0 = inlined_call_operand.vmem [shape: bf16[128,128], index: 0, kind: input, shape index: {}]   ;;  %s588_s2 = inlined_call_operand.vmem [shape: f32[1,128], index: 2, kind: input, shape index: {}]   ;;  %s589_s3 = inlined_call_operand.vmem [shape: f32[128,128], index: 3, kind: output, shape index: {}]  }
   0x1   :  { %v451_v0 = vld [vmem:[%s586_s1] sm:$0xff]   ;;  %v452_v1 = vld [vmem:[%s586_s1 + $0x8] sm:$0xff]   ;;  %v453_v2 = vld [vmem:[%s586_s1 + $0x10] sm:$0xff]  }
   0x2   :  { %403 = vmatprep.subr.bf16.mxu0 %v451_v0  ;;  %435 = vmatprep.subr.bf16.mxu1 %v451_v0  ;;  %v454_v3 = vld [vmem:[%s586_s1 + $0x18] sm:$0xff]   ;;  %v459_v4 = vld [vmem:[%s587_s0] sm:$0xff]   ;;  %v456_v7 = vld [vmem:[%s586_s1 + $0x28] sm:$0xff]  }
   0x3   :  { %404 = vmatpush3.bf16.msra.mxu0 %v451_v0  ;;  %443 = vmatpush3.bf16.msra.mxu1 %v451_v0  ;;  %v460_v5 = vld [vmem:[%s587_s0 + $0x20] sm:$0xff]   ;;  %v457_v8 = vld [vmem:[%s586_s1 + $0x30] sm:$0xff]   ;;  %v458_v9 = vld [vmem:[%s586_s1 + $0x38] sm:$0xff]  }
   0x4   :  { %405 = vmatprep.subr.bf16.mxu0 %v452_v1  ;;  %436 = vmatprep.subr.bf16.mxu1 %v452_v1  ;;  %v455_v6 = vld [vmem:[%s586_s1 + $0x20] sm:$0xff]   ;;  %v461_v10 = vld [vmem:[%s587_s0 + $0x8] sm:$0xff]   ;;  %v463_v12 = vld [vmem:[%s587_s0 + $0x10] sm:$0xff]  }
   0x5   :  { %419 = vmatprep.mubr.bf16.mxu0 %v459_v4  ;;  %427 = vmatprep.mubr.bf16.mxu1 %v460_v5  ;;  %v462_v11 = vld [vmem:[%s587_s0 + $0x28] sm:$0xff]   ;;  %v464_v13 = vld [vmem:[%s587_s0 + $0x30] sm:$0xff]   ;;  %v465_v14 = vld [vmem:[%s587_s0 + $0x18] sm:$0xff]  }
   0x6   :  { %v466_v15 = vld [vmem:[%s587_s0 + $0x38] sm:$0xff]   ;;  %v386_v16 = vld [vmem:[%s588_s2] ss:$0 sm:$0xff] }
   0x7   :  { %406 = vmatpush3.bf16.msra.mxu0 %v452_v1  ;;  %444 = vmatpush3.bf16.msra.mxu1 %v452_v1 }
   0x8   :  { %407 = vmatprep.subr.bf16.mxu0 %v453_v2  ;;  %437 = vmatprep.subr.bf16.mxu1 %v453_v2 }
   0xb   :  { %408 = vmatpush3.bf16.msra.mxu0 %v453_v2  ;;  %445 = vmatpush3.bf16.msra.mxu1 %v453_v2 }
   0xc   :  { %409 = vmatprep.subr.bf16.mxu0 %v454_v3  ;;  %438 = vmatprep.subr.bf16.mxu1 %v454_v3 }
   0xf   :  { %410 = vmatpush3.bf16.msra.mxu0 %v454_v3  ;;  %446 = vmatpush3.bf16.msra.mxu1 %v454_v3 }
  0x10   :  { %411 = vmatprep.subr.bf16.mxu0 %v455_v6  ;;  %439 = vmatprep.subr.bf16.mxu1 %v455_v6 }
  0x13   :  { %412 = vmatpush3.bf16.msra.mxu0 %v455_v6  ;;  %447 = vmatpush3.bf16.msra.mxu1 %v455_v6 }
  0x14   :  { %413 = vmatprep.subr.bf16.mxu0 %v456_v7  ;;  %440 = vmatprep.subr.bf16.mxu1 %v456_v7 }
  0x17   :  { %414 = vmatpush3.bf16.msra.mxu0 %v456_v7  ;;  %448 = vmatpush3.bf16.msra.mxu1 %v456_v7 }
  0x18   :  { %415 = vmatprep.subr.bf16.mxu0 %v457_v8  ;;  %441 = vmatprep.subr.bf16.mxu1 %v457_v8 }
  0x1b   :  { %416 = vmatpush3.bf16.msra.mxu0 %v457_v8  ;;  %449 = vmatpush3.bf16.msra.mxu1 %v457_v8 }
  0x1c   :  { %417 = vmatprep.subr.bf16.mxu0 %v458_v9  ;;  %442 = vmatprep.subr.bf16.mxu1 %v458_v9 }
  0x1f   :  { %418 = vmatpush3.bf16.msra.mxu0 %v458_v9  ;;  %450 = vmatpush3.bf16.msra.mxu1 %v458_v9 }
  0x22   :  { %420 = vmatmul.mubr.bf16.vlgmr.msra.gmra.mrb[0].mxu0 %v461_v10  ;;  %428 = vmatmul.mubr.bf16.vlgmr.msra.gmra.mrb[0].mxu1 %v462_v11 }
  0x23   :  { %423 = vmatprep.mubr.bf16.mxu0 %v463_v12  ;;  %431 = vmatprep.mubr.bf16.mxu1 %v464_v13 }
  0x2a   :  { %424 = vmatmul.mubr.bf16.gmra.mrb[4].mxu0 %v465_v14  ;;  %432 = vmatmul.mubr.bf16.gmra.mrb[4].mxu1 %v466_v15 }
  0xf5   :  { %v421_v17 = vpop.f32.mrb[0].mxu0  ;;  %v429_v18 = vpop.f32.mrb[0].mxu1 }
  0xf6   :  { %v336_v19 = vadd.f32 %v421_v17, %v386_v16  ;;  %v344_v20 = vadd.f32 %v429_v18, %v386_v16  ;;  %v213_v21 = vpop.f32.mrb[1].mxu0  ;;  %v245_v22 = vpop.f32.mrb[1].mxu1 }
  0xf7   :  { %v334_v23 = vadd.f32 %v386_v16, %v213_v21  ;;  %v342_v24 = vadd.f32 %v386_v16, %v245_v22  ;;  %v422_v25 = vpop.f32.mrb[2].mxu0  ;;  %v430_v26 = vpop.f32.mrb[2].mxu1 }
  0xf8   :  { %352 = vst [vmem:[%s589_s3 + $0x10] sm:$0xff] %v336_v19  ;;  %360 = vst [vmem:[%s589_s3 + $0x50] sm:$0xff] %v344_v20  ;;  %v337_v27 = vadd.f32 %v422_v25, %v386_v16  ;;  %v345_v28 = vadd.f32 %v430_v26, %v386_v16  ;;  %v216_v29 = vpop.f32.mrb[3].mxu0  ;;  %v248_v30 = vpop.f32.mrb[3].mxu1 }
  0xf9   :  { %350 = vst [vmem:[%s589_s3] sm:$0xff] %v334_v23  ;;  %358 = vst [vmem:[%s589_s3 + $0x40] sm:$0xff] %v342_v24  ;;  %v335_v31 = vadd.f32 %v386_v16, %v216_v29  ;;  %v343_v32 = vadd.f32 %v386_v16, %v248_v30 }
  0xfa   :  { %353 = vst [vmem:[%s589_s3 + $0x18] sm:$0xff] %v337_v27  ;;  %361 = vst [vmem:[%s589_s3 + $0x58] sm:$0xff] %v345_v28 }
  0xfb   :  { %351 = vst [vmem:[%s589_s3 + $0x8] sm:$0xff] %v335_v31  ;;  %359 = vst [vmem:[%s589_s3 + $0x48] sm:$0xff] %v343_v32 }
  0xfd   :  { %v425_v33 = vpop.f32.mrb[4].mxu0  ;;  %v433_v34 = vpop.f32.mrb[4].mxu1 }
  0xfe   :  { %v340_v35 = vadd.f32 %v425_v33, %v386_v16  ;;  %v348_v36 = vadd.f32 %v433_v34, %v386_v16  ;;  %v229_v37 = vpop.f32.mrb[5].mxu0  ;;  %v261_v38 = vpop.f32.mrb[5].mxu1 }
  0xff   :  { %v338_v39 = vadd.f32 %v386_v16, %v229_v37  ;;  %v346_v40 = vadd.f32 %v386_v16, %v261_v38  ;;  %v426_v41 = vpop.f32.mrb[6].mxu0  ;;  %v434_v42 = vpop.f32.mrb[6].mxu1 }
 0x100   :  { %356 = vst [vmem:[%s589_s3 + $0x30] sm:$0xff] %v340_v35  ;;  %364 = vst [vmem:[%s589_s3 + $0x70] sm:$0xff] %v348_v36  ;;  %v341_v43 = vadd.f32 %v426_v41, %v386_v16  ;;  %v349_v44 = vadd.f32 %v434_v42, %v386_v16  ;;  %v232_v45 = vpop.f32.mrb[7].mxu0  ;;  %v264_v46 = vpop.f32.mrb[7].mxu1 }
 0x101   :  { %354 = vst [vmem:[%s589_s3 + $0x20] sm:$0xff] %v338_v39  ;;  %362 = vst [vmem:[%s589_s3 + $0x60] sm:$0xff] %v346_v40  ;;  %v339_v47 = vadd.f32 %v386_v16, %v232_v45  ;;  %v347_v48 = vadd.f32 %v386_v16, %v264_v46 }
 0x102   :  { %357 = vst [vmem:[%s589_s3 + $0x38] sm:$0xff] %v341_v43  ;;  %365 = vst [vmem:[%s589_s3 + $0x78] sm:$0xff] %v349_v44 }
 0x103   :  { %355 = vst [vmem:[%s589_s3 + $0x28] sm:$0xff] %v339_v47  ;;  %363 = vst [vmem:[%s589_s3 + $0x68] sm:$0xff] %v347_v48 }

</bundles_post_ra>
